<compile_context>
chip_gen: v6e
topology: v6e:2x2x1
jax: 0.10.0
libtpu: 0.0.40
codegen_flags: <defaults>
</compile_context>

<pallas_src>
import functools

import jax
import jax.numpy as jnp
from jax.experimental import pallas as pl
from jax.experimental.pallas import tpu as pltpu

HIDDEN = 300          # fixed hidden width of the PyTorch module
LANE = 128
SUBLANE = 8
DEFAULT_TM = 256      # batch-tile rows once batch grows


def _round_up(n, m):
    return ((n + m - 1) // m) * m


def _pad2(a, rows, cols):
    return jnp.pad(a, ((0, rows - a.shape[0]), (0, cols - a.shape[1])))


def _mlp_kernel(x_ref, w1_ref, b1_ref, w2_ref, b2_ref, w3_ref, b3_ref, o_ref):
    # One batch tile: matmuls on the MXU (bf16 inputs, f32 accumulation),
    # bias-add / ReLU on the VPU in f32.
    x = x_ref[...]
    h1 = jnp.dot(x, w1_ref[...], preferred_element_type=jnp.float32) + b1_ref[...]
    h1 = jnp.maximum(h1, 0.0)
    h2 = jnp.dot(h1.astype(w2_ref.dtype), w2_ref[...],
                 preferred_element_type=jnp.float32) + b2_ref[...]
    h2 = jnp.maximum(h2, 0.0)
    o_ref[...] = (jnp.dot(h2.astype(w3_ref.dtype), w3_ref[...],
                          preferred_element_type=jnp.float32) + b3_ref[...])


@jax.jit
def generator_forward(x, params):
    """params: w1 (inp,300), b1 (1,300), w2 (300,300), b2 (1,300),
    w3 (300,out), b3 (1,out) — all float32.  x: (batch, inp) float32."""
    batch, inp = x.shape
    out_dim = params["w3"].shape[1]

    in_p = _round_up(inp, LANE)        # lane-align the contraction dims
    hid_p = _round_up(HIDDEN, LANE)    # 300 -> 384 (keeps 2 MXU K-passes)
    out_p = _round_up(out_dim, LANE)   # lane-dense output stores

    tm = min(DEFAULT_TM, _round_up(batch, SUBLANE))
    b_p = _round_up(batch, tm)
    grid = (b_p // tm,)

    # Zero padding is exact: padded x cols hit zero weight rows, padded weight
    # cols + zero bias give 0 -> ReLU(0)=0 -> contribute nothing downstream.
    x_p = _pad2(x, b_p, in_p).astype(jnp.bfloat16)
    w1 = _pad2(params["w1"], in_p, hid_p).astype(jnp.bfloat16)
    w2 = _pad2(params["w2"], hid_p, hid_p).astype(jnp.bfloat16)
    w3 = _pad2(params["w3"], hid_p, out_p).astype(jnp.bfloat16)
    b1 = _pad2(params["b1"], 1, hid_p)
    b2 = _pad2(params["b2"], 1, hid_p)
    b3 = _pad2(params["b3"], 1, out_p)

    flops = 2 * b_p * (in_p * hid_p + hid_p * hid_p + hid_p * out_p)
    bytes_accessed = (
        2 * (x_p.size + w1.size + w2.size + w3.size)          # bf16 operands
        + 4 * (b1.size + b2.size + b3.size)                   # f32 biases
        + 4 * b_p * out_p                                     # f32 output
    )

    y_p = pl.pallas_call(
        _mlp_kernel,
        out_shape=jax.ShapeDtypeStruct((b_p, out_p), jnp.float32),
        grid_spec=pltpu.PrefetchScalarGridSpec(
            num_scalar_prefetch=0,
            grid=grid,
            in_specs=[
                pl.BlockSpec((tm, in_p), lambda i: (i, 0)),      # x streams
                pl.BlockSpec((in_p, hid_p), lambda i: (0, 0)),   # weights resident
                pl.BlockSpec((1, hid_p), lambda i: (0, 0)),
                pl.BlockSpec((hid_p, hid_p), lambda i: (0, 0)),
                pl.BlockSpec((1, hid_p), lambda i: (0, 0)),
                pl.BlockSpec((hid_p, out_p), lambda i: (0, 0)),
                pl.BlockSpec((1, out_p), lambda i: (0, 0)),
            ],
            out_specs=pl.BlockSpec((tm, out_p), lambda i: (i, 0)),
        ),
        compiler_params=pltpu.CompilerParams(
            dimension_semantics=("parallel",),   # shard batch tiles over TCs
        ),
        cost_estimate=pl.CostEstimate(
            flops=flops, transcendentals=0, bytes_accessed=bytes_accessed),
    )(x_p, w1, b1, w2, b2, w3, b3)

    return y_p[:batch, :out_dim]


def init_params(key, inp, out):
    """Deterministic init mimicking PyTorch Linear default (U(+/- 1/sqrt(fan_in)))."""
    ks = jax.random.split(key, 6)

    def lin(kw, kb, fan_in, fan_out):
        bound = 1.0 / jnp.sqrt(jnp.float32(fan_in))
        w = jax.random.uniform(kw, (fan_in, fan_out), jnp.float32, -bound, bound)
        b = jax.random.uniform(kb, (1, fan_out), jnp.float32, -bound, bound)
        return w, b

    w1, b1 = lin(ks[0], ks[1], inp, HIDDEN)
    w2, b2 = lin(ks[2], ks[3], HIDDEN, HIDDEN)
    w3, b3 = lin(ks[4], ks[5], HIDDEN, out)
    return {"w1": w1, "b1": b1, "w2": w2, "b2": b2, "w3": w3, "b3": b3}


if __name__ == "__main__":
    key = jax.random.PRNGKey(0)
    k_x, k_p = jax.random.split(key)

    batch, inp, out = 8, 32, 16
    x = jax.random.normal(k_x, (batch, inp), dtype=jnp.float32)
    params = init_params(k_p, inp, out)

    y = generator_forward(x, params)
    jax.block_until_ready(y)
    assert y.shape == (batch, out)

    # Reference 1: same bf16-input / f32-accumulate math in pure JAX (tight tol).
    xb = x.astype(jnp.bfloat16)
    w1b = params["w1"].astype(jnp.bfloat16)
    w2b = params["w2"].astype(jnp.bfloat16)
    w3b = params["w3"].astype(jnp.bfloat16)
    r = jnp.maximum(jnp.dot(xb, w1b, preferred_element_type=jnp.float32)
                    + params["b1"], 0.0)
    r = jnp.maximum(jnp.dot(r.astype(jnp.bfloat16), w2b,
                            preferred_element_type=jnp.float32)
                    + params["b2"], 0.0)
    ref_bf16 = jnp.dot(r.astype(jnp.bfloat16), w3b,
                       preferred_element_type=jnp.float32) + params["b3"]
    assert jnp.allclose(y, ref_bf16, atol=1e-3, rtol=1e-3)

    # Reference 2: full f32 math (loose tol — bf16 matmul inputs).
    ref = jnp.maximum(x @ params["w1"] + params["b1"], 0.0)
    ref = jnp.maximum(ref @ params["w2"] + params["b2"], 0.0)
    ref = ref @ params["w3"] + params["b3"]
    assert jnp.allclose(y, ref, atol=5e-2, rtol=5e-2)

    print("KERNEL_OK")
</pallas_src>

<mosaic_0001>
module attributes {stable_mosaic.version = 11 : i64} {
  func.func @_mlp_kernel(%arg0: i32, %arg1: memref<8x128xbf16, #tpu.memory_space<vmem>>, %arg2: memref<128x384xbf16, #tpu.memory_space<vmem>>, %arg3: memref<1x384xf32, #tpu.memory_space<vmem>>, %arg4: memref<384x384xbf16, #tpu.memory_space<vmem>>, %arg5: memref<1x384xf32, #tpu.memory_space<vmem>>, %arg6: memref<384x128xbf16, #tpu.memory_space<vmem>>, %arg7: memref<1x128xf32, #tpu.memory_space<vmem>>, %arg8: memref<8x128xf32, #tpu.memory_space<vmem>>) attributes {dimension_semantics = [#tpu.dimension_semantics<parallel>], iteration_bounds = array<i64: 1>, scalar_prefetch = 0 : i64, scratch_operands = 0 : i64, tpu.core_type = #tpu.core_type<tc>, window_params = [{transform_indices = @transform_0, window_bounds = array<i64: 8, 128>}, {pipeline_mode = #tpu.pipeline_mode<synchronous>, transform_indices = @transform_1, window_bounds = array<i64: 128, 384>}, {pipeline_mode = #tpu.pipeline_mode<synchronous>, transform_indices = @transform_2, window_bounds = array<i64: 1, 384>}, {pipeline_mode = #tpu.pipeline_mode<synchronous>, transform_indices = @transform_3, window_bounds = array<i64: 384, 384>}, {pipeline_mode = #tpu.pipeline_mode<synchronous>, transform_indices = @transform_4, window_bounds = array<i64: 1, 384>}, {pipeline_mode = #tpu.pipeline_mode<synchronous>, transform_indices = @transform_5, window_bounds = array<i64: 384, 128>}, {pipeline_mode = #tpu.pipeline_mode<synchronous>, transform_indices = @transform_6, window_bounds = array<i64: 1, 128>}, {transform_indices = @transform_7, window_bounds = array<i64: 8, 128>}]} {
    %c0 = arith.constant 0 : index
    %c0_0 = arith.constant 0 : index
    %0 = vector.load %arg1[%c0, %c0_0] : memref<8x128xbf16, #tpu.memory_space<vmem>>, vector<8x128xbf16>
    %c0_1 = arith.constant 0 : index
    %c0_2 = arith.constant 0 : index
    %1 = vector.load %arg2[%c0_1, %c0_2] : memref<128x384xbf16, #tpu.memory_space<vmem>>, vector<128x384xbf16>
    %cst = arith.constant dense<0.000000e+00> : vector<8x384xf32>
    %2 = tpu.matmul %0, %1, %cst {dimension_numbers = #tpu.dot_dimension_numbers<[1], [0], [0], [1], [0, 0, 1, 1], [], []>} : vector<8x128xbf16>, vector<128x384xbf16>, vector<8x384xf32> -> vector<8x384xf32>
    %c0_3 = arith.constant 0 : index
    %c0_4 = arith.constant 0 : index
    %3 = vector.load %arg3[%c0_3, %c0_4] : memref<1x384xf32, #tpu.memory_space<vmem>>, vector<1x384xf32>
    %4 = vector.broadcast %3 : vector<1x384xf32> to vector<8x384xf32>
    %5 = arith.addf %2, %4 : vector<8x384xf32>
    %cst_5 = arith.constant 0.000000e+00 : f32
    %6 = vector.broadcast %cst_5 : f32 to vector<8x384xf32>
    %7 = arith.maximumf %5, %6 : vector<8x384xf32>
    %8 = arith.truncf %7 : vector<8x384xf32> to vector<8x384xbf16>
    %c0_6 = arith.constant 0 : index
    %c0_7 = arith.constant 0 : index
    %9 = vector.load %arg4[%c0_6, %c0_7] : memref<384x384xbf16, #tpu.memory_space<vmem>>, vector<384x384xbf16>
    %cst_8 = arith.constant dense<0.000000e+00> : vector<8x384xf32>
    %10 = tpu.matmul %8, %9, %cst_8 {dimension_numbers = #tpu.dot_dimension_numbers<[1], [0], [0], [1], [0, 0, 1, 1], [], []>} : vector<8x384xbf16>, vector<384x384xbf16>, vector<8x384xf32> -> vector<8x384xf32>
    %c0_9 = arith.constant 0 : index
    %c0_10 = arith.constant 0 : index
    %11 = vector.load %arg5[%c0_9, %c0_10] : memref<1x384xf32, #tpu.memory_space<vmem>>, vector<1x384xf32>
    %12 = vector.broadcast %11 : vector<1x384xf32> to vector<8x384xf32>
    %13 = arith.addf %10, %12 : vector<8x384xf32>
    %cst_11 = arith.constant 0.000000e+00 : f32
    %14 = vector.broadcast %cst_11 : f32 to vector<8x384xf32>
    %15 = arith.maximumf %13, %14 : vector<8x384xf32>
    %16 = arith.truncf %15 : vector<8x384xf32> to vector<8x384xbf16>
    %c0_12 = arith.constant 0 : index
    %c0_13 = arith.constant 0 : index
    %17 = vector.load %arg6[%c0_12, %c0_13] : memref<384x128xbf16, #tpu.memory_space<vmem>>, vector<384x128xbf16>
    %cst_14 = arith.constant dense<0.000000e+00> : vector<8x128xf32>
    %18 = tpu.matmul %16, %17, %cst_14 {dimension_numbers = #tpu.dot_dimension_numbers<[1], [0], [0], [1], [0, 0, 1, 1], [], []>} : vector<8x384xbf16>, vector<384x128xbf16>, vector<8x128xf32> -> vector<8x128xf32>
    %c0_15 = arith.constant 0 : index
    %c0_16 = arith.constant 0 : index
    %19 = vector.load %arg7[%c0_15, %c0_16] : memref<1x128xf32, #tpu.memory_space<vmem>>, vector<1x128xf32>
    %20 = vector.broadcast %19 : vector<1x128xf32> to vector<8x128xf32>
    %21 = arith.addf %18, %20 : vector<8x128xf32>
    %c0_17 = arith.constant 0 : index
    %c0_18 = arith.constant 0 : index
    %22 = vector.load %arg8[%c0_17, %c0_18] : memref<8x128xf32, #tpu.memory_space<vmem>>, vector<8x128xf32>
    tpu.vector_store %arg8[%c0_17, %c0_18], %21 {strides = array<i32>} : memref<8x128xf32, #tpu.memory_space<vmem>>, vector<8x128xf32>,
    return
  }
  func.func @transform_0(%arg0: i32) -> (i32, i32) {
    %c0_i32 = arith.constant 0 : i32
    %c0_i32_0 = arith.constant 0 : i32
    return %arg0, %c0_i32 : i32, i32
  }
  func.func @transform_1(%arg0: i32) -> (i32, i32) {
    %c0_i32 = arith.constant 0 : i32
    %c0_i32_0 = arith.constant 0 : i32
    %c0_i32_1 = arith.constant 0 : i32
    return %c0_i32, %c0_i32_0 : i32, i32
  }
  func.func @transform_2(%arg0: i32) -> (i32, i32) {
    %c0_i32 = arith.constant 0 : i32
    %c0_i32_0 = arith.constant 0 : i32
    %c0_i32_1 = arith.constant 0 : i32
    return %c0_i32, %c0_i32_0 : i32, i32
  }
  func.func @transform_3(%arg0: i32) -> (i32, i32) {
    %c0_i32 = arith.constant 0 : i32
    %c0_i32_0 = arith.constant 0 : i32
    %c0_i32_1 = arith.constant 0 : i32
    return %c0_i32, %c0_i32_0 : i32, i32
  }
  func.func @transform_4(%arg0: i32) -> (i32, i32) {
    %c0_i32 = arith.constant 0 : i32
    %c0_i32_0 = arith.constant 0 : i32
    %c0_i32_1 = arith.constant 0 : i32
    return %c0_i32, %c0_i32_0 : i32, i32
  }
  func.func @transform_5(%arg0: i32) -> (i32, i32) {
    %c0_i32 = arith.constant 0 : i32
    %c0_i32_0 = arith.constant 0 : i32
    %c0_i32_1 = arith.constant 0 : i32
    return %c0_i32, %c0_i32_0 : i32, i32
  }
  func.func @transform_6(%arg0: i32) -> (i32, i32) {
    %c0_i32 = arith.constant 0 : i32
    %c0_i32_0 = arith.constant 0 : i32
    %c0_i32_1 = arith.constant 0 : i32
    return %c0_i32, %c0_i32_0 : i32, i32
  }
  func.func @transform_7(%arg0: i32) -> (i32, i32) {
    %c0_i32 = arith.constant 0 : i32
    %c0_i32_0 = arith.constant 0 : i32
    return %arg0, %c0_i32 : i32, i32
  }
}

</mosaic_0001>

<bundles_post_ra>
// kernel: generator_forward.1
= control target key start
LH: loop header
LB: loop body
LE: loop exit
PB: predicated region body
PF: predicated region fallthrough
CT: control target
= control target key end

     0   :  { %v1682_v1 = vmov 0.0   ;;  %vm1683_vm0 = vmmov 0   ;;  %v1684_v5 = vmov 0   ;;  %s2154_s0 = inlined_call_operand.vmem [shape: bf16[8,128], index: 0, kind: input, shape index: {}]   ;;  %s2155_s1 = inlined_call_operand.vmem [shape: bf16[128,384], index: 1, kind: input, shape index: {}]   ;;  %s2156_s2 = inlined_call_operand.vmem [shape: f32[1,384], index: 2, kind: input, shape index: {}]   ;;  %s2157_s3 = inlined_call_operand.vmem [shape: bf16[384,384], index: 3, kind: input, shape index: {}]   ;;  %s2158_s4 = inlined_call_operand.vmem [shape: f32[1,384], index: 4, kind: input, shape index: {}]   ;;  %s2159_s5 = inlined_call_operand.vmem [shape: bf16[384,128], index: 5, kind: input, shape index: {}]   ;;  %s2160_s6 = inlined_call_operand.vmem [shape: f32[1,128], index: 6, kind: input, shape index: {}]   ;;  %s2161_s7 = inlined_call_operand.hbm [shape: f32[8,128], index: 7, kind: output, shape index: {}]  }
   0x1   :  { %v1508_v0 = vld [vmem:[%s2155_s1 + $0xac] ss:$12 sps:$4 sm:$0xff]   ;;  %1444 = vmatprep.subr.bf16.mxu1 %v1682_v1  ;;  %v1510_v2 = vld [vmem:[%s2155_s1 + $0xb0] ss:$12 sps:$4 sm:$0xff]   ;;  %1460 = vmatprep.mubr.msk.bf16.mxu1 %vm1683_vm0, %v1682_v1  ;;  %v1511_v3 = vld [vmem:[%s2155_s1 + $0xa8] ss:$12 sps:$4 sm:$0xff]  }
   0x2   :  { %206 = vmatprep.subr.bf16.mxu0 %v1508_v0  ;;  %1445 = vmatpush3.bf16.msra.mxu1 %v1510_v2  ;;  %v1512_v4 = vld [vmem:[%s2155_s1 + $0x94] ss:$12 sps:$4 sm:$0xff]   ;;  %v1514_v6 = vld [vmem:[%s2155_s1 + $0x98] ss:$12 sps:$4 sm:$0xff]   ;;  %v1515_v7 = vld [vmem:[%s2155_s1 + $0x90] ss:$12 sps:$4 sm:$0xff]  }
   0x3   :  { %238 = vmatprep.mubr.bf16.mxu0 %v1684_v5  ;;  %207 = vmatpush1.bf16.msra.mxu0 %v1511_v3  ;;  %v1516_v8 = vld [vmem:[%s2155_s1 + $0x7c] ss:$12 sps:$4 sm:$0xff]   ;;  %v1518_v9 = vld [vmem:[%s2155_s1 + $0x80] ss:$12 sps:$4 sm:$0xff]   ;;  %v1519_v10 = vld [vmem:[%s2155_s1 + $0x78] ss:$12 sps:$4 sm:$0xff]  }
   0x4   :  { %1446 = vmatprep.subr.bf16.mxu1 %v1682_v1  ;;  %208 = vmatprep.subr.bf16.mxu0 %v1512_v4  ;;  %v1520_v11 = vld [vmem:[%s2155_s1 + $0x64] ss:$12 sps:$4 sm:$0xff]   ;;  %v1522_v12 = vld [vmem:[%s2155_s1 + $0x68] ss:$12 sps:$4 sm:$0xff]   ;;  %v1523_v13 = vld [vmem:[%s2155_s1 + $0x60] ss:$12 sps:$4 sm:$0xff]  }
   0x5   :  { %v1524_v14 = vld [vmem:[%s2155_s1 + $0x4c] ss:$12 sps:$4 sm:$0xff]   ;;  %v1526_v15 = vld [vmem:[%s2155_s1 + $0x50] ss:$12 sps:$4 sm:$0xff]   ;;  %v1527_v16 = vld [vmem:[%s2155_s1 + $0x48] ss:$12 sps:$4 sm:$0xff]  }
   0x6   :  { %1447 = vmatpush3.bf16.msra.mxu1 %v1514_v6  ;;  %v1528_v17 = vld [vmem:[%s2155_s1 + $0x34] ss:$12 sps:$4 sm:$0xff]   ;;  %v1530_v18 = vld [vmem:[%s2155_s1 + $0x38] ss:$12 sps:$4 sm:$0xff]   ;;  %v1531_v19 = vld [vmem:[%s2155_s1 + $0x30] ss:$12 sps:$4 sm:$0xff]  }
   0x7   :  { %209 = vmatpush1.bf16.msra.mxu0 %v1515_v7  ;;  %1448 = vmatprep.subr.bf16.mxu1 %v1682_v1  ;;  %v1532_v20 = vld [vmem:[%s2155_s1 + $0x1c] ss:$12 sps:$4 sm:$0xff]   ;;  %v1534_v21 = vld [vmem:[%s2155_s1 + $0x20] ss:$12 sps:$4 sm:$0xff]   ;;  %v1535_v22 = vld [vmem:[%s2155_s1 + $0x18] ss:$12 sps:$4 sm:$0xff]  }
   0x8   :  { %210 = vmatprep.subr.bf16.mxu0 %v1516_v8  ;;  %v1536_v23 = vld [vmem:[%s2155_s1 + $0x4] ss:$12 sps:$4 sm:$0xff]   ;;  %v1538_v24 = vld [vmem:[%s2155_s1 + $0x8] ss:$12 sps:$4 sm:$0xff]   ;;  %v1539_v25 = vld [vmem:[%s2155_s1] ss:$12 sps:$4 sm:$0xff]  }
   0x9   :  { %v1542_v26 = vld [vmem:[%s2157_s3 + $0xac] ss:$12 sps:$4 sm:$0xff]   ;;  %v28_v27 = vld [vmem:[%s2154_s0] sm:$0xf]  ;;  %v1564_v29 = vld [vmem:[%s2157_s3 + $0x228] ss:$12 sps:$4 sm:$0xff]  }
   0xa   :  { %1449 = vmatpush3.bf16.msra.mxu1 %v1518_v9  ;;  %v1566_v28 = vld [vmem:[%s2157_s3 + $0x22c] ss:$12 sps:$4 sm:$0xff]   ;;  %v1540_v30 = vld [vmem:[%s2157_s3 + $0xa8] ss:$12 sps:$4 sm:$0xff]   ;;  %v1543_v33 = vld [vmem:[%s2157_s3 + $0x90] ss:$12 sps:$4 sm:$0xff]  }
   0xb   :  { %211 = vmatpush1.bf16.msra.mxu0 %v1519_v10  ;;  %1450 = vmatprep.subr.bf16.mxu1 %v1682_v1  ;;  %v1545_v31 = vld [vmem:[%s2157_s3 + $0x94] ss:$12 sps:$4 sm:$0xff]   ;;  %v1570_v34 = vld [vmem:[%s2157_s3 + $0x210] ss:$12 sps:$4 sm:$0xff]   ;;  %v1546_v37 = vld [vmem:[%s2157_s3 + $0x78] ss:$12 sps:$4 sm:$0xff]  }
   0xc   :  { %212 = vmatprep.subr.bf16.mxu0 %v1520_v11  ;;  %v1572_v32 = vld [vmem:[%s2157_s3 + $0x214] ss:$12 sps:$4 sm:$0xff]   ;;  %v1578_v35 = vld [vmem:[%s2157_s3 + $0x1fc] ss:$12 sps:$4 sm:$0xff]   ;;  %v1576_v38 = vld [vmem:[%s2157_s3 + $0x1f8] ss:$12 sps:$4 sm:$0xff]  }
   0xd   :  { %v1548_v36 = vld [vmem:[%s2157_s3 + $0x7c] ss:$12 sps:$4 sm:$0xff]   ;;  %v1584_v39 = vld [vmem:[%s2157_s3 + $0x1e4] ss:$12 sps:$4 sm:$0xff]   ;;  %v1549_v41 = vld [vmem:[%s2157_s3 + $0x60] ss:$12 sps:$4 sm:$0xff]  }
   0xe   :  { %1451 = vmatpush3.bf16.msra.mxu1 %v1522_v12  ;;  %v1551_v40 = vld [vmem:[%s2157_s3 + $0x64] ss:$12 sps:$4 sm:$0xff]   ;;  %v1582_v42 = vld [vmem:[%s2157_s3 + $0x1e0] ss:$12 sps:$4 sm:$0xff]   ;;  %v1552_v45 = vld [vmem:[%s2157_s3 + $0x48] ss:$12 sps:$4 sm:$0xff]  }
   0xf   :  { %213 = vmatpush1.bf16.msra.mxu0 %v1523_v13  ;;  %1452 = vmatprep.subr.bf16.mxu1 %v1682_v1  ;;  %v1590_v43 = vld [vmem:[%s2157_s3 + $0x1cc] ss:$12 sps:$4 sm:$0xff]   ;;  %v1588_v46 = vld [vmem:[%s2157_s3 + $0x1c8] ss:$12 sps:$4 sm:$0xff]   ;;  %v1594_v49 = vld [vmem:[%s2157_s3 + $0x1b0] ss:$12 sps:$4 sm:$0xff]  }
  0x10   :  { %214 = vmatprep.subr.bf16.mxu0 %v1524_v14  ;;  %v1554_v44 = vld [vmem:[%s2157_s3 + $0x4c] ss:$12 sps:$4 sm:$0xff]   ;;  %v1557_v47 = vld [vmem:[%s2157_s3 + $0x34] ss:$12 sps:$4 sm:$0xff]   ;;  %v1555_v50 = vld [vmem:[%s2157_s3 + $0x30] ss:$12 sps:$4 sm:$0xff]  }
  0x11   :  { %v1596_v48 = vld [vmem:[%s2157_s3 + $0x1b4] ss:$12 sps:$4 sm:$0xff]   ;;  %v1602_v51 = vld [vmem:[%s2157_s3 + $0x19c] ss:$12 sps:$4 sm:$0xff]   ;;  %v1600_v53 = vld [vmem:[%s2157_s3 + $0x198] ss:$12 sps:$4 sm:$0xff]  }
  0x12   :  { %1453 = vmatpush3.bf16.msra.mxu1 %v1526_v15  ;;  %v1560_v52 = vld [vmem:[%s2157_s3 + $0x1c] ss:$12 sps:$4 sm:$0xff]   ;;  %v1558_v54 = vld [vmem:[%s2157_s3 + $0x18] ss:$12 sps:$4 sm:$0xff]   ;;  %v1561_v56 = vld [vmem:[%s2157_s3] ss:$12 sps:$4 sm:$0xff]  }
  0x13   :  { %215 = vmatpush1.bf16.msra.mxu0 %v1527_v16  ;;  %1454 = vmatprep.subr.bf16.mxu1 %v1682_v1  ;;  %v1563_v55 = vld [vmem:[%s2157_s3 + $0x4] ss:$12 sps:$4 sm:$0xff]   ;;  %v1569_v57 = vld [vmem:[%s2157_s3 + $0x16c] ss:$12 sps:$4 sm:$0xff]   ;;  %v1567_v58 = vld [vmem:[%s2157_s3 + $0x168] ss:$12 sps:$4 sm:$0xff]  }
  0x14   :  { %216 = vmatprep.subr.bf16.mxu0 %v1528_v17  ;;  %v1575_v59 = vld [vmem:[%s2157_s3 + $0x154] ss:$12 sps:$4 sm:$0xff]   ;;  %v1573_v60 = vld [vmem:[%s2157_s3 + $0x150] ss:$12 sps:$4 sm:$0xff]   ;;  %v1579_v62 = vld [vmem:[%s2157_s3 + $0x138] ss:$12 sps:$4 sm:$0xff]  }
  0x15   :  { %v1581_v61 = vld [vmem:[%s2157_s3 + $0x13c] ss:$12 sps:$4 sm:$0xff]   ;;  %v1587_v63 = vld [vmem:[%s2157_s3 + $0x124] ss:$12 sps:$4 sm:$0xff]   ;;  %v1585_v0 = vld [vmem:[%s2157_s3 + $0x120] ss:$12 sps:$4 sm:$0xff]  }
  0x16   :  { %1455 = vmatpush3.bf16.msra.mxu1 %v1530_v18  ;;  %v1593_v2 = vld [vmem:[%s2157_s3 + $0x10c] ss:$12 sps:$4 sm:$0xff]   ;;  %v1591_v3 = vld [vmem:[%s2157_s3 + $0x108] ss:$12 sps:$4 sm:$0xff]  }
  0x17   :  { %217 = vmatpush1.bf16.msra.mxu0 %v1531_v19  ;;  %1456 = vmatprep.subr.bf16.mxu1 %v1682_v1  ;;  %v1599_v4 = vld [vmem:[%s2157_s3 + $0xf4] ss:$12 sps:$4 sm:$0xff]  }
  0x18   :  { %218 = vmatprep.subr.bf16.mxu0 %v1532_v20 }
  0x1a   :  { %1457 = vmatpush3.bf16.msra.mxu1 %v1534_v21 }
  0x1b   :  { %219 = vmatpush1.bf16.msra.mxu0 %v1535_v22  ;;  %1458 = vmatprep.subr.bf16.mxu1 %v1682_v1 }
  0x1c   :  { %220 = vmatprep.subr.bf16.mxu0 %v1536_v23 }
  0x1e   :  { %1459 = vmatpush3.bf16.msra.mxu1 %v1538_v24 }
  0x1f   :  { %221 = vmatpush1.bf16.msra.mxu0 %v1539_v25  ;;  %831 = vmatprep.subr.bf16.mxu1 %v1566_v28 }
  0x20   :  { %790 = vmatprep.subr.bf16.mxu0 %v1542_v26 }
  0x21   :  { %1461 = vmatmul.mubr.bf16.vlgmr.msra.gmra.mxu1 %v28_v27 }
  0x22   :  { %239 = vmatmul.mubr.bf16.vlgmr.msra.gmra.mxu0 %v28_v27  ;;  %832 = vmatpush1.bf16.msra.mxu1 %v1564_v29 }
  0x23   :  { %791 = vmatpush1.bf16.msra.mxu0 %v1540_v30  ;;  %833 = vmatprep.subr.bf16.mxu1 %v1572_v32 }
  0x24   :  { %792 = vmatprep.subr.bf16.mxu0 %v1545_v31  ;;  %863 = vmatprep.mubr.bf16.mxu1 %v1684_v5 }
  0x26   :  { %834 = vmatpush1.bf16.msra.mxu1 %v1570_v34 }
  0x27   :  { %793 = vmatpush1.bf16.msra.mxu0 %v1543_v33  ;;  %835 = vmatprep.subr.bf16.mxu1 %v1578_v35 }
  0x28   :  { %794 = vmatprep.subr.bf16.mxu0 %v1548_v36 }
  0x2a   :  { %836 = vmatpush1.bf16.msra.mxu1 %v1576_v38 }
  0x2b   :  { %795 = vmatpush1.bf16.msra.mxu0 %v1546_v37  ;;  %837 = vmatprep.subr.bf16.mxu1 %v1584_v39 }
  0x2c   :  { %796 = vmatprep.subr.bf16.mxu0 %v1551_v40 }
  0x2e   :  { %838 = vmatpush1.bf16.msra.mxu1 %v1582_v42 }
  0x2f   :  { %797 = vmatpush1.bf16.msra.mxu0 %v1549_v41  ;;  %839 = vmatprep.subr.bf16.mxu1 %v1590_v43 }
  0x30   :  { %798 = vmatprep.subr.bf16.mxu0 %v1554_v44 }
  0x32   :  { %840 = vmatpush1.bf16.msra.mxu1 %v1588_v46 }
  0x33   :  { %799 = vmatpush1.bf16.msra.mxu0 %v1552_v45  ;;  %841 = vmatprep.subr.bf16.mxu1 %v1596_v48 }
  0x34   :  { %800 = vmatprep.subr.bf16.mxu0 %v1557_v47 }
  0x36   :  { %842 = vmatpush1.bf16.msra.mxu1 %v1594_v49 }
  0x37   :  { %801 = vmatpush1.bf16.msra.mxu0 %v1555_v50  ;;  %843 = vmatprep.subr.bf16.mxu1 %v1602_v51 }
  0x38   :  { %802 = vmatprep.subr.bf16.mxu0 %v1560_v52 }
  0x3a   :  { %844 = vmatpush1.bf16.msra.mxu1 %v1600_v53 }
  0x3b   :  { %803 = vmatpush1.bf16.msra.mxu0 %v1558_v54 }
  0x3c   :  { %804 = vmatprep.subr.bf16.mxu0 %v1563_v55 }
  0x3f   :  { %805 = vmatpush1.bf16.msra.mxu0 %v1561_v56 }
  0x40   :  { %806 = vmatprep.subr.bf16.mxu0 %v1569_v57 }
  0x43   :  { %807 = vmatpush2.bf16.msra.mxu0 %v1567_v58 }
  0x44   :  { %808 = vmatprep.subr.bf16.mxu0 %v1575_v59 }
  0x47   :  { %809 = vmatpush2.bf16.msra.mxu0 %v1573_v60 }
  0x48   :  { %810 = vmatprep.subr.bf16.mxu0 %v1581_v61 }
  0x4b   :  { %811 = vmatpush2.bf16.msra.mxu0 %v1579_v62 }
  0x4c   :  { %812 = vmatprep.subr.bf16.mxu0 %v1587_v63 }
  0x4f   :  { %813 = vmatpush2.bf16.msra.mxu0 %v1585_v0 }
  0x50   :  { %814 = vmatprep.subr.bf16.mxu0 %v1593_v2 }
  0x51   :  { %12 = vsyncpa [#allocation3], 0  ;;  %v1597_v5 = vld [vmem:[%s2157_s3 + $0xf0] ss:$12 sps:$4 sm:$0xff]   ;;  %v1603_v8 = vld [vmem:[%s2157_s3 + $0xd8] ss:$12 sps:$4 sm:$0xff]   ;;  %v63_v13 = vlaneseq }
  0x52   :  { %v1605_v6 = vld [vmem:[%s2157_s3 + $0xdc] ss:$12 sps:$4 sm:$0xff]   ;;  %v1608_v7 = vld [vmem:[%s2157_s3 + $0x184] ss:$12 sps:$4 sm:$0xff]   ;;  %v1606_v9 = vld [vmem:[%s2157_s3 + $0x180] ss:$12 sps:$4 sm:$0xff]  }
  0x53   :  { %815 = vmatpush2.bf16.msra.mxu0 %v1591_v3  ;;  %845 = vmatprep.subr.bf16.mxu1 %v1608_v7  ;;  %v1611_v10 = vld [vmem:[%s2157_s3 + $0xc4] ss:$12 sps:$4 sm:$0xff]   ;;  %v1609_v12 = vld [vmem:[%s2157_s3 + $0xc0] ss:$12 sps:$4 sm:$0xff]   ;;  %v1961_v14 = vshrl.u32 %v63_v13, 7  ;;  %v1636_v61 = vld [vmem:[%s2159_s5 + $0x78] sm:$0xff]  }
  0x54   :  { %816 = vmatprep.subr.bf16.mxu0 %v1599_v4  ;;  %846 = vmatpush1.bf16.msra.mxu1 %v1606_v9  ;;  %v1612_v11 = vld [vmem:[%s2157_s3 + $0x170] ss:$12 sps:$4 sm:$0xff]   ;;  %v61_v16 = vld [vmem:[%s2156_s2] sm:$0x7]  ;;  %v1614_v35 = vld [vmem:[%s2157_s3 + $0x158] ss:$12 sps:$4 sm:$0xff]  }
  0x55   :  { %1382 = vmatprep.subr.bf16.mxu1 %v1612_v11  ;;  %v73_v15 = vsub.s32 2, %v1961_v14  ;;  %v65_v17 = vsub.s32 0, %v1961_v14  ;;  %v69_v18 = vsub.s32 1, %v1961_v14  ;;  %v1613_v32 = vld [vmem:[%s2157_s3 + $0xb0] ss:$12 sps:$4 sm:$0xff]   ;;  %v1640_v3 = vld [vmem:[%s2159_s5 + $0x68] sm:$0xff]  }
  0x56   :  { %v1615_v41 = vld [vmem:[%s2157_s3 + $0x98] ss:$12 sps:$4 sm:$0xff]   ;;  %v1616_v42 = vld [vmem:[%s2157_s3 + $0x230] ss:$12 sps:$4 sm:$0xff]   ;;  %v1617_v43 = vld [vmem:[%s2157_s3 + $0x140] ss:$12 sps:$4 sm:$0xff]  }
  0x57   :  { %817 = vmatpush2.bf16.msra.mxu0 %v1597_v5  ;;  %v74_v19 = vrot.slane %v61_v16, %v73_v15  ;;  %v66_v20 = vrot.slane %v61_v16, %v65_v17  ;;  %v70_v22 = vrot.slane %v61_v16, %v69_v18  ;;  %v1618_v44 = vld [vmem:[%s2157_s3 + $0x80] ss:$12 sps:$4 sm:$0xff]   ;;  %v1619_v45 = vld [vmem:[%s2157_s3 + $0x218] ss:$12 sps:$4 sm:$0xff]   ;;  %v1620_v46 = vld [vmem:[%s2157_s3 + $0x128] ss:$12 sps:$4 sm:$0xff]  }
  0x58   :  { %818 = vmatprep.subr.bf16.mxu0 %v1605_v6  ;;  %v1621_v47 = vld [vmem:[%s2157_s3 + $0x68] ss:$12 sps:$4 sm:$0xff]   ;;  %v1622_v48 = vld [vmem:[%s2157_s3 + $0x200] ss:$12 sps:$4 sm:$0xff]   ;;  %v1623_v49 = vld [vmem:[%s2157_s3 + $0x110] ss:$12 sps:$4 sm:$0xff]  }
  0x59   :  { %v1624_v50 = vld [vmem:[%s2157_s3 + $0x50] ss:$12 sps:$4 sm:$0xff]   ;;  %v1625_v51 = vld [vmem:[%s2157_s3 + $0x1e8] ss:$12 sps:$4 sm:$0xff]   ;;  %v1626_v52 = vld [vmem:[%s2157_s3 + $0xf8] ss:$12 sps:$4 sm:$0xff]  }
  0x5a   :  { %v1627_v53 = vld [vmem:[%s2157_s3 + $0x38] ss:$12 sps:$4 sm:$0xff]   ;;  %v1628_v54 = vld [vmem:[%s2157_s3 + $0x1d0] ss:$12 sps:$4 sm:$0xff]   ;;  %v1629_v55 = vld [vmem:[%s2157_s3 + $0xe0] ss:$12 sps:$4 sm:$0xff]  }
  0x5b   :  { %819 = vmatpush2.bf16.msra.mxu0 %v1603_v8  ;;  %v1630_v56 = vld [vmem:[%s2157_s3 + $0x20] ss:$12 sps:$4 sm:$0xff]   ;;  %v1631_v57 = vld [vmem:[%s2157_s3 + $0x1b8] ss:$12 sps:$4 sm:$0xff]   ;;  %v1632_v58 = vld [vmem:[%s2157_s3 + $0xc8] ss:$12 sps:$4 sm:$0xff]  }
  0x5c   :  { %820 = vmatprep.subr.bf16.mxu0 %v1611_v10  ;;  %v1633_v59 = vld [vmem:[%s2157_s3 + $0x8] ss:$12 sps:$4 sm:$0xff]   ;;  %v1634_v60 = vld [vmem:[%s2157_s3 + $0x1a0] ss:$12 sps:$4 sm:$0xff]   ;;  %v1637_v63 = vld [vmem:[%s2159_s5 + $0x38] sm:$0xff]   ;;  %s1685_s18 = smov [#allocation2]  }
  0x5d   :  { %v1635_v62 = vld [vmem:[%s2157_s3 + $0x188] ss:$12 sps:$4 sm:$0xff]   ;;  %v1642_v5 = vld [vmem:[%s2159_s5 + $0x60] sm:$0xff]   ;;  %v1644_v7 = vld [vmem:[%s2159_s5 + $0x58] sm:$0xff]   ;;  %s1244_s19 = sshll.u32 %s1685_s18, 4  ;;  %s1245_s19 = int_to_ptr.vmem [resolvable:$true] %s1244_s19 }
  0x5e   :  { %v1638_v0 = vld [vmem:[%s2159_s5 + $0x70] sm:$0xff]   ;;  %v1641_v4 = vld [vmem:[%s2159_s5 + $0x28] sm:$0xff]   ;;  %v1643_v6 = vld [vmem:[%s2159_s5 + $0x20] sm:$0xff]   ;;  %s1660_s20 = scalar_lea.vmem %s1245_s19, 128  ;;  %p1665_p1 = scmp.lt.s32.totalorder %s1245_s19, %s1245_s19 }
  0x5f   :  { %821 = vmatpush2.bf16.msra.mxu0 %v1609_v12  ;;  %v1639_v2 = vld [vmem:[%s2159_s5 + $0x30] sm:$0xff]   ;;  %v1645_v8 = vld [vmem:[%s2159_s5 + $0x18] sm:$0xff]   ;;  %v1648_v11 = vld [vmem:[%s2159_s5 + $0x48] sm:$0xff]   ;;  %p1661_p0 = scmp.ne.s32.totalorder %s1245_s19, %s1660_s20  ;;  %p1666_p2 = scmp.lt.s32.totalorder %s1660_s20, %s1660_s20 }
  0x60   :  { %1464 = vmatprep.subr.bf16.mxu0 %v1682_v1  ;;  %v1646_v9 = vld [vmem:[%s2159_s5 + $0x50] sm:$0xff]   ;;  %v1649_v12 = vld [vmem:[%s2159_s5 + $0x8] sm:$0xff]   ;;  %v1650_v13 = vld [vmem:[%s2159_s5 + $0x40] sm:$0xff]  }
  0x61   :  { %v1647_v10 = vld [vmem:[%s2159_s5 + $0x10] sm:$0xff]   ;;  %v1651_v16 = vld [vmem:[%s2159_s5] sm:$0xff]   ;;  %p1667_p3 = por %p1666_p2, %p1665_p1 }
  0x62   :  { %v1348_v14 = vld [vmem:[%s2160_s6] ss:$0 sm:$0xff] }
  0x63   :  { %p1668_p4 = pnand %p1667_p3, %p1661_p0 }
  0xe1   :  { %v281_v21 = vpop.f32.mrf.mxu1 }
  0xe2   :  { %v282_v23 = vadd.f32 %v281_v21, %v74_v19  ;;  %v240_v24 = vpop.f32.mrf.mxu0  ;;  %v1652_v19 = vld [vmem:[%s2159_s5 + $0xb8] sm:$0xff]   ;;  %v1654_v21 = vld [vmem:[%s2159_s5 + $0xa8] sm:$0xff]  }
  0xe3   :  { %v241_v25 = vadd.f32 %v240_v24, %v66_v20  ;;  %v1462_v26 = vpop.f32.mrf.mxu1  ;;  %v1653_v20 = vld [vmem:[%s2159_s5 + $0xb0] sm:$0xff]  }
  0xe4   :  { %v289_v27 = vmax.f32 %v282_v23, 0.0  ;;  %v242_v28 = vpop.f32.mrf.mxu0  ;;  %v1656_v23 = vld [vmem:[%s2159_s5 + $0x98] sm:$0xff]   ;;  %v1657_v24 = vld [vmem:[%s2159_s5 + $0x90] sm:$0xff]   ;;  %v1659_v26 = vld [vmem:[%s2159_s5 + $0x80] sm:$0xff]  }
  0xe5   :  { %v287_v29 = vmax.f32 %v241_v25, 0.0  ;;  %v243_v30 = vadd.f32 %v242_v28, %v70_v22  ;;  %v284_v31 = vpop.f32.mrf.mxu1  ;;  %v1655_v22 = vld [vmem:[%s2159_s5 + $0xa0] sm:$0xff]   ;;  %v1658_v25 = vld [vmem:[%s2159_s5 + $0x88] sm:$0xff]  }
  0xe6   :  { %v1978_v33 = vpack.c.bf16 %v289_v27, %v289_v27  ;;  %v244_v34 = vpop.f32.mrf.mxu0  ;;  %v389_v27 = vld [vmem:[%s2158_s4] sm:$0x7] }
  0xe7   :  { %v288_v36 = vmax.f32 %v243_v30, 0.0  ;;  %v1463_v37 = vpop.f32.mrf.mxu1  ;;  %v290_v38 = vpack.c.bf16 %v287_v29, %v287_v29  ;;  %v394_v29 = vrot.slane %v389_v27, %v65_v17  ;;  %v398_v31 = vrot.slane %v389_v27, %v69_v18 }
  0xe8   :  { %v245_v39 = vpop.f32.mrf.mxu0  ;;  %864 = vmatmul.mubr.bf16.vlgmr.msra.gmra.mxu1 %v1978_v33  ;;  %v402_v18 = vrot.slane %v389_v27, %v73_v15 }
  0xe9   :  { %v291_v40 = vpack.c.bf16 %v288_v36, %v288_v36  ;;  %1383 = vmatpush3.bf16.msra.mxu1 %v1613_v32 }
  0xea   :  { %1384 = vmatprep.subr.bf16.mxu1 %v1614_v35 }
  0xeb   :  { %822 = vmatprep.mubr.bf16.mxu0 %v291_v40  ;;  %904 = vmatprep.mubr.bf16.mxu1 %v291_v40 }
  0xec   :  { %823 = vmatmul.mubr.bf16.vlgmr.msra.gmra.mxu0 %v290_v38 }
  0xed   :  { %1385 = vmatpush3.bf16.msra.mxu1 %v1615_v41  ;;  %1465 = vmatpush3.bf16.msra.mxu0 %v1616_v42 }
  0xee   :  { %1386 = vmatprep.subr.bf16.mxu1 %v1617_v43  ;;  %1466 = vmatprep.subr.bf16.mxu0 %v1682_v1 }
  0xef   :  { %1480 = vmatprep.mubr.msk.bf16.mxu0 %vm1683_vm0, %v1682_v1 }
  0xf1   :  { %1387 = vmatpush3.bf16.msra.mxu1 %v1618_v44  ;;  %1467 = vmatpush3.bf16.msra.mxu0 %v1619_v45 }
  0xf2   :  { %1388 = vmatprep.subr.bf16.mxu1 %v1620_v46  ;;  %1468 = vmatprep.subr.bf16.mxu0 %v1682_v1 }
  0xf5   :  { %1389 = vmatpush3.bf16.msra.mxu1 %v1621_v47  ;;  %1469 = vmatpush3.bf16.msra.mxu0 %v1622_v48 }
  0xf6   :  { %1390 = vmatprep.subr.bf16.mxu1 %v1623_v49  ;;  %1470 = vmatprep.subr.bf16.mxu0 %v1682_v1 }
  0xf9   :  { %1391 = vmatpush3.bf16.msra.mxu1 %v1624_v50  ;;  %1471 = vmatpush3.bf16.msra.mxu0 %v1625_v51 }
  0xfa   :  { %1392 = vmatprep.subr.bf16.mxu1 %v1626_v52  ;;  %1472 = vmatprep.subr.bf16.mxu0 %v1682_v1 }
  0xfd   :  { %1393 = vmatpush3.bf16.msra.mxu1 %v1627_v53  ;;  %1473 = vmatpush3.bf16.msra.mxu0 %v1628_v54 }
  0xfe   :  { %1394 = vmatprep.subr.bf16.mxu1 %v1629_v55  ;;  %1474 = vmatprep.subr.bf16.mxu0 %v1682_v1 }
 0x101   :  { %1395 = vmatpush3.bf16.msra.mxu1 %v1630_v56  ;;  %1475 = vmatpush3.bf16.msra.mxu0 %v1631_v57 }
 0x102   :  { %1396 = vmatprep.subr.bf16.mxu1 %v1632_v58  ;;  %1476 = vmatprep.subr.bf16.mxu0 %v1682_v1 }
 0x105   :  { %1397 = vmatpush3.bf16.msra.mxu1 %v1633_v59  ;;  %1477 = vmatpush3.bf16.msra.mxu0 %v1634_v60 }
 0x106   :  { %1478 = vmatprep.subr.bf16.mxu0 %v1682_v1  ;;  %1413 = vmatprep.subr.bf16.mxu1 %v1636_v61 }
 0x108   :  { %905 = vmatmul.mubr.bf16.vlgmr.msra.gmra.mxu1 %v290_v38 }
 0x109   :  { %1479 = vmatpush3.bf16.msra.mxu0 %v1635_v62  ;;  %1414 = vmatpush3.bf16.msra.mxu1 %v1637_v63 }
 0x10a   :  { %1415 = vmatprep.subr.bf16.mxu1 %v1638_v0  ;;  %1484 = vmatprep.subr.bf16.mxu0 %v1682_v1 }
 0x10c   :  { %1481 = vmatmul.mubr.bf16.vlgmr.msra.gmra.mxu0 %v1978_v33 }
 0x10d   :  { %1416 = vmatpush3.bf16.msra.mxu1 %v1639_v2  ;;  %1500 = vmatprep.mubr.msk.bf16.mxu0 %vm1683_vm0, %v1682_v1 }
 0x10e   :  { %1417 = vmatprep.subr.bf16.mxu1 %v1640_v3  ;;  %1485 = vmatpush3.bf16.msra.mxu0 %v1652_v19 }
 0x10f   :  { %1486 = vmatprep.subr.bf16.mxu0 %v1682_v1 }
 0x111   :  { %1418 = vmatpush3.bf16.msra.mxu1 %v1641_v4 }
 0x112   :  { %1419 = vmatprep.subr.bf16.mxu1 %v1642_v5  ;;  %1487 = vmatpush3.bf16.msra.mxu0 %v1653_v20 }
 0x113   :  { %1488 = vmatprep.subr.bf16.mxu0 %v1682_v1 }
 0x115   :  { %1420 = vmatpush3.bf16.msra.mxu1 %v1643_v6 }
 0x116   :  { %1421 = vmatprep.subr.bf16.mxu1 %v1644_v7  ;;  %1489 = vmatpush3.bf16.msra.mxu0 %v1654_v21 }
 0x117   :  { %1490 = vmatprep.subr.bf16.mxu0 %v1682_v1 }
 0x119   :  { %1422 = vmatpush3.bf16.msra.mxu1 %v1645_v8 }
 0x11a   :  { %1423 = vmatprep.subr.bf16.mxu1 %v1646_v9  ;;  %1491 = vmatpush3.bf16.msra.mxu0 %v1655_v22 }
 0x11b   :  { %1492 = vmatprep.subr.bf16.mxu0 %v1682_v1 }
 0x11d   :  { %1424 = vmatpush3.bf16.msra.mxu1 %v1647_v10 }
 0x11e   :  { %1425 = vmatprep.subr.bf16.mxu1 %v1648_v11  ;;  %1493 = vmatpush3.bf16.msra.mxu0 %v1656_v23 }
 0x11f   :  { %1494 = vmatprep.subr.bf16.mxu0 %v1682_v1 }
 0x121   :  { %1426 = vmatpush3.bf16.msra.mxu1 %v1649_v12 }
 0x122   :  { %1427 = vmatprep.subr.bf16.mxu1 %v1650_v13  ;;  %1495 = vmatpush3.bf16.msra.mxu0 %v1657_v24 }
 0x123   :  { %1496 = vmatprep.subr.bf16.mxu0 %v1682_v1 }
 0x125   :  { %1428 = vmatpush3.bf16.msra.mxu1 %v1651_v16 }
 0x126   :  { %1497 = vmatpush3.bf16.msra.mxu0 %v1658_v25 }
 0x127   :  { %1498 = vmatprep.subr.bf16.mxu0 %v1682_v1 }
 0x12a   :  { %1499 = vmatpush3.bf16.msra.mxu0 %v1659_v26 }
 0x1a8   :  { %v865_v28 = vpop.f32.mrf.mxu1 }
 0x1aa   :  { %v867_v30 = vpop.f32.mrf.mxu1 }
 0x1ac   :  { %v824_v32 = vpop.f32.mrf.mxu0  ;;  %v869_v33 = vpop.f32.mrf.mxu1 }
 0x1ad   :  { %v825_v1 = vadd.f32 %v824_v32, %v394_v29 }
 0x1ae   :  { %v826_v34 = vpop.f32.mrf.mxu0  ;;  %v870_v35 = vpop.f32.mrf.mxu1 }
 0x1af   :  { %v866_v36 = vadd.f32 %v865_v28, %v825_v1  ;;  %v827_v37 = vadd.f32 %v826_v34, %v398_v31 }
 0x1b0   :  { %v828_v38 = vpop.f32.mrf.mxu0 }
 0x1b1   :  { %v868_v39 = vadd.f32 %v867_v30, %v827_v37  ;;  %v952_v40 = vmax.f32 %v866_v36, 0.0 }
 0x1b2   :  { %v829_v41 = vpop.f32.mrf.mxu0 }
 0x1b3   :  { %v953_v42 = vmax.f32 %v868_v39, 0.0  ;;  %v955_v44 = vpack.c.bf16 %v952_v40, %v952_v40 }
 0x1b5   :  { %v956_v43 = vpack.c.bf16 %v953_v42, %v953_v42 }
 0x1b7   :  { %1189 = vmatprep.mubr.bf16.mxu1 %v956_v43 }
 0x1b8   :  { %1190 = vmatmul.mubr.bf16.vlgmr.msra.gmra.mxu1 %v955_v44 }
 0x1c8   :  { %v1398_v17 = vpop.f32.mrf.mxu1 }
 0x1ca   :  { %v1399_v45 = vpop.f32.mrf.mxu1 }
 0x1cb   :  { %v1400_v46 = vadd.f32 %v1399_v45, %v1398_v17 }
 0x1cc   :  { %v1401_v47 = vpop.f32.mrf.mxu1  ;;  %v946_v48 = vpop.f32.mrf.mxu0 }
 0x1cd   :  { %v907_v49 = vadd.f32 %v1400_v46, %v402_v18 }
 0x1ce   :  { %v1402_v50 = vpop.f32.mrf.mxu1  ;;  %v1482_v51 = vpop.f32.mrf.mxu0 }
 0x1cf   :  { %v947_v52 = vadd.f32 %v946_v48, %v907_v49 }
 0x1d0   :  { %v949_v53 = vpop.f32.mrf.mxu0 }
 0x1d1   :  { %v954_v54 = vmax.f32 %v947_v52, 0.0 }
 0x1d2   :  { %v1483_v55 = vpop.f32.mrf.mxu0 }
 0x1d3   :  { %v957_v56 = vpack.c.bf16 %v954_v54, %v954_v54 }
 0x1d5   :  { %1501 = vmatmul.mubr.bf16.vlgmr.msra.gmra.mxu0 %v957_v56 }
 0x278   :  { %v1429_v57 = vpop.f32.mrf.mxu1 }
 0x27a   :  { %v1430_v58 = vpop.f32.mrf.mxu1 }
 0x27b   :  { %v1431_v61 = vadd.f32 %v1430_v58, %v1429_v57 }
 0x27c   :  { %v1432_v59 = vpop.f32.mrf.mxu1 }
 0x27d   :  { %v1192_v15 = vadd.f32 %v1431_v61, %v1348_v14 }
 0x27e   :  { %v1433_v60 = vpop.f32.mrf.mxu1 }
 0x295   :  { %v1231_v62 = vpop.f32.mrf.mxu0 }
 0x296   :  { %v1232_v63 = vadd.f32 %v1231_v62, %v1192_v15 }
 0x297   :  { %v1502_v0 = vpop.f32.mrf.mxu0 }
 0x298   :  { %1237 = vst [vmem:[#allocation2] sm:$0xff] %v1232_v63 }
 0x299   :  { %v1234_v2 = vpop.f32.mrf.mxu0 }
 0x29a   :  { %1671 = shalt.err (!%p1668_p4)
}
 0x29b   :  { %1247 = dma.vmem_to_hbm [thread:$0]  %s1245_s19, 128, %s2161_s7, [#allocation3]   ;;  %v1503_v3 = vpop.f32.mrf.mxu0 }
 0x29c   :  { %1680 = dma.done.wait [#allocation3], 128  }
 0x29d   :  { %1681 = vsyncadd [#allocation3], 4294967168 }
 0x29e   :  { %1251 = vsyncpa [#allocation3], 1 }

</bundles_post_ra>
